<compile_context>
chip_gen: v6e
topology: v6e:2x2x1
jax: 0.10.0
libtpu: 0.0.40
codegen_flags: <defaults>
</compile_context>

<pallas_src>
import jax
import jax.numpy as jnp
from jax.experimental import pallas as pl
from jax.experimental.pallas import tpu as pltpu


_LN_EPS = 1e-5


def _pick_strip_tile(n_strips, w2, c, c_out, elem_bytes,
                     vmem_budget_bytes=20 * 1024 * 1024, max_unroll=16):
    """Pick TS = number of 2-row strips per grid step.

    Accounts for double-buffered input/output blocks, the resident bf16
    weights, and ~4x f32 temporaries of the activation block.  Keeps >= 2 grid
    steps so v7x's two TensorCores can split the parallel grid, and picks a
    divisor of n_strips so no ragged/padded block is ever needed.
    """
    c2_in = 2 * c
    per_strip = (2 * (2 * w2 * c2_in) * elem_bytes        # input block  (x2 buffers)
                 + 2 * (w2 * c_out) * elem_bytes          # output block (x2 buffers)
                 + 4 * (2 * w2 * c2_in) * 4)              # f32 temporaries in-kernel
    w_bytes = 2 * (c2_in * c_out * 2) * 2 + c_out * 4     # two bf16 weights (x2) + bias
    budget = max(vmem_budget_bytes - w_bytes, per_strip)
    ts = int(max(1, min(max_unroll, budget // per_strip, n_strips)))
    if n_strips >= 2:
        ts = max(1, min(ts, n_strips // 2))                # ensure >= 2 grid steps
    best = 1
    for d in range(1, ts + 1):                             # largest divisor <= ts
        if n_strips % d == 0:
            best = d
    return best, per_strip, w_bytes


# ----------------------------------------------------------------------------
# Fused 2x2-gather + LayerNorm(4C) + Linear(4C -> 2C) kernel
# ----------------------------------------------------------------------------
def patch_merging_kernel(x_ref, wa_ref, wb_ref, bias_ref, o_ref):
    # x_ref   : (TS, 2, W2, 2C) strips of two consecutive padded-H rows; the W
    #           pair-merge was done by a free wrapper reshape, so
    #           x_ref[:, 0] channels = [x0 | x2], x_ref[:, 1] channels = [x1 | x3].
    # wa_ref  : (2C, Cout) bf16  gamma-folded weight rows for [x0 | x2]
    # wb_ref  : (2C, Cout) bf16  gamma-folded weight rows for [x1 | x3]
    # bias_ref: (1, Cout)  f32   beta @ W
    # o_ref   : (TS, W2, Cout)
    x = x_ref[...].astype(jnp.float32)
    xh0 = x[:, 0]                                   # (TS, W2, 2C) even-H rows
    xh1 = x[:, 1]                                   # (TS, W2, 2C) odd-H rows
    inv_n = 1.0 / (2 * xh0.shape[-1])               # 1 / (4C)
    mu = (jnp.sum(xh0, axis=-1, keepdims=True)
          + jnp.sum(xh1, axis=-1, keepdims=True)) * inv_n
    ex2 = (jnp.sum(xh0 * xh0, axis=-1, keepdims=True)
           + jnp.sum(xh1 * xh1, axis=-1, keepdims=True)) * inv_n
    var = jnp.maximum(ex2 - mu * mu, 0.0)           # one-pass variance, f32
    inv_sigma = jax.lax.rsqrt(var + _LN_EPS)
    xhat0 = ((xh0 - mu) * inv_sigma).astype(jnp.bfloat16)
    xhat1 = ((xh1 - mu) * inv_sigma).astype(jnp.bfloat16)

    wa = wa_ref[...]
    wb = wb_ref[...]
    bias = bias_ref[...]
    for s in range(x_ref.shape[0]):                 # static unroll, TS <= 16
        acc = jnp.dot(xhat0[s], wa, preferred_element_type=jnp.float32)
        acc = acc + jnp.dot(xhat1[s], wb, preferred_element_type=jnp.float32)
        o_ref[s] = (acc + bias).astype(o_ref.dtype)


def patch_merging(x, gamma, beta, w_red):
    """x: (B, H, W, C); gamma/beta: (4C,); w_red: (4C, 2C) (applied as x @ w_red)."""
    B, H, W, C = x.shape
    Hp, Wp = H + (H % 2), W + (W % 2)
    if (Hp, Wp) != (H, W):                          # F.pad(...) equivalent
        x = jnp.pad(x, ((0, 0), (0, Hp - H), (0, Wp - W), (0, 0)))
    H2, W2 = Hp // 2, Wp // 2
    S = B * H2
    C2_in = 2 * C
    C_out = w_red.shape[-1]

    # Free, contiguous reshape (no HBM data movement):
    #   xv[s, hp, w2, wp*C + c] == x[b, 2*h2+hp, 2*w2+wp, c],  s = b*H2 + h2
    xv = x.reshape(S, 2, W2, C2_in)

    # Fold the LN affine into the GEMM and pre-permute weight rows so the kernel
    # never interleaves channels.  torch order [x0, x1, x2, x3]:
    #   even-H kernel channels [x0 | x2] -> w_a ;  odd-H channels [x1 | x3] -> w_b
    gamma_f = gamma.reshape(-1).astype(jnp.float32)
    beta_f = beta.reshape(-1).astype(jnp.float32)
    w_f = w_red.astype(jnp.float32)
    wg = gamma_f[:, None] * w_f
    w_a = jnp.concatenate([wg[0:C], wg[2 * C:3 * C]], axis=0).astype(jnp.bfloat16)
    w_b = jnp.concatenate([wg[C:2 * C], wg[3 * C:4 * C]], axis=0).astype(jnp.bfloat16)
    bias = (beta_f @ w_f).reshape(1, C_out)          # f32, added after the matmul

    ts, per_strip, w_bytes = _pick_strip_tile(S, W2, C, C_out, x.dtype.itemsize)
    vmem_est = w_bytes + ts * per_strip
    vmem_limit = int(min(64 * 1024 * 1024, max(32 * 1024 * 1024, 2 * vmem_est)))

    out = pl.pallas_call(
        patch_merging_kernel,
        out_shape=jax.ShapeDtypeStruct((S, W2, C_out), x.dtype),
        grid=(S // ts,),
        in_specs=[
            pl.BlockSpec((ts, 2, W2, C2_in), lambda i: (i, 0, 0, 0)),
            pl.BlockSpec((C2_in, C_out), lambda i: (0, 0)),   # constant: DMA'd once
            pl.BlockSpec((C2_in, C_out), lambda i: (0, 0)),   # constant: DMA'd once
            pl.BlockSpec((1, C_out), lambda i: (0, 0)),       # constant: DMA'd once
        ],
        out_specs=pl.BlockSpec((ts, W2, C_out), lambda i: (i, 0, 0)),
        compiler_params=pltpu.CompilerParams(
            dimension_semantics=("parallel",),
            vmem_limit_bytes=vmem_limit),
    )(xv, w_a, w_b, bias)

    return out.reshape(B, H2, W2, C_out)


# ----------------------------------------------------------------------------
# Pure-JAX reference (mirrors the PyTorch module line-by-line)
# ----------------------------------------------------------------------------
def patch_merging_ref(x, gamma, beta, w_red):
    B, H, W, C = x.shape
    if H % 2 == 1 or W % 2 == 1:
        x = jnp.pad(x, ((0, 0), (0, H % 2), (0, W % 2), (0, 0)))
    x0 = x[:, 0::2, 0::2, :]
    x1 = x[:, 1::2, 0::2, :]
    x2 = x[:, 0::2, 1::2, :]
    x3 = x[:, 1::2, 1::2, :]
    xc = jnp.concatenate([x0, x1, x2, x3], axis=-1)
    mu = jnp.mean(xc, axis=-1, keepdims=True)
    var = jnp.mean((xc - mu) ** 2, axis=-1, keepdims=True)
    xn = (xc - mu) * jax.lax.rsqrt(var + _LN_EPS) * gamma + beta
    return jnp.dot(xn, w_red)


# ----------------------------------------------------------------------------
if __name__ == "__main__":
    key = jax.random.PRNGKey(0)
    kx, kg, kb, kw, kx2 = jax.random.split(key, 5)

    B, H, W, C = 2, 16, 16, 4
    x = jax.random.normal(kx, (B, H, W, C), dtype=jnp.float32)
    gamma = 1.0 + 0.1 * jax.random.normal(kg, (4 * C,), dtype=jnp.float32)
    beta = 0.1 * jax.random.normal(kb, (4 * C,), dtype=jnp.float32)
    w_red = 0.02 * jax.random.normal(kw, (4 * C, 2 * C), dtype=jnp.float32)

    y = patch_merging(x, gamma, beta, w_red)
    jax.block_until_ready(y)
    assert y.shape == (B, H // 2, W // 2, 2 * C) and y.dtype == x.dtype
    y_ref = patch_merging_ref(x, gamma, beta, w_red)
    assert float(jnp.max(jnp.abs(y - y_ref))) < 1e-2

    # Odd spatial dims exercise the F.pad path.
    x_odd = jax.random.normal(kx2, (B, 7, 5, C), dtype=jnp.float32)
    y_odd = patch_merging(x_odd, gamma, beta, w_red)
    jax.block_until_ready(y_odd)
    assert y_odd.shape == (B, 4, 3, 2 * C)
    y_odd_ref = patch_merging_ref(x_odd, gamma, beta, w_red)
    assert float(jnp.max(jnp.abs(y_odd - y_odd_ref))) < 1e-2

    print("KERNEL_OK")
</pallas_src>

<mosaic_0001>
module attributes {stable_mosaic.version = 11 : i64} {
  func.func @patch_merging_kernel(%arg0: i32, %arg1: memref<8x2x8x8xf32, #tpu.memory_space<vmem>>, %arg2: memref<8x8xbf16, #tpu.memory_space<vmem>>, %arg3: memref<8x8xbf16, #tpu.memory_space<vmem>>, %arg4: memref<1x8xf32, #tpu.memory_space<vmem>>, %arg5: memref<8x8x8xf32, #tpu.memory_space<vmem>>) attributes {dimension_semantics = [#tpu.dimension_semantics<parallel>], iteration_bounds = array<i64: 2>, scalar_prefetch = 0 : i64, scratch_operands = 0 : i64, tpu.core_type = #tpu.core_type<tc>, window_params = [{transform_indices = @transform_0, window_bounds = array<i64: 8, 2, 8, 8>}, {pipeline_mode = #tpu.pipeline_mode<synchronous>, transform_indices = @transform_1, window_bounds = array<i64: 8, 8>}, {pipeline_mode = #tpu.pipeline_mode<synchronous>, transform_indices = @transform_2, window_bounds = array<i64: 8, 8>}, {pipeline_mode = #tpu.pipeline_mode<synchronous>, transform_indices = @transform_3, window_bounds = array<i64: 1, 8>}, {transform_indices = @transform_4, window_bounds = array<i64: 8, 8, 8>}]} {
    %c0 = arith.constant 0 : index
    %c0_0 = arith.constant 0 : index
    %c0_1 = arith.constant 0 : index
    %c0_2 = arith.constant 0 : index
    %0 = vector.load %arg1[%c0, %c0_0, %c0_1, %c0_2] : memref<8x2x8x8xf32, #tpu.memory_space<vmem>>, vector<8x2x8x8xf32>
    %1 = vector.extract_strided_slice %0 {offsets = [0, 0, 0, 0], sizes = [8, 1, 8, 8], strides = [1, 1, 1, 1]} : vector<8x2x8x8xf32> to vector<8x1x8x8xf32>
    %2 = vector.shape_cast %1 : vector<8x1x8x8xf32> to vector<8x8x8xf32>
    %3 = vector.extract_strided_slice %0 {offsets = [0, 1, 0, 0], sizes = [8, 1, 8, 8], strides = [1, 1, 1, 1]} : vector<8x2x8x8xf32> to vector<8x1x8x8xf32>
    %4 = vector.shape_cast %3 : vector<8x1x8x8xf32> to vector<8x8x8xf32>
    %cst = arith.constant dense<0.000000e+00> : vector<8x8xf32>
    %5 = vector.multi_reduction <add>, %2, %cst [2] : vector<8x8x8xf32> to vector<8x8xf32>
    %6 = vector.shape_cast %5 : vector<8x8xf32> to vector<8x8x1xf32>
    %cst_3 = arith.constant dense<0.000000e+00> : vector<8x8xf32>
    %7 = vector.multi_reduction <add>, %4, %cst_3 [2] : vector<8x8x8xf32> to vector<8x8xf32>
    %8 = vector.shape_cast %7 : vector<8x8xf32> to vector<8x8x1xf32>
    %9 = arith.addf %6, %8 : vector<8x8x1xf32>
    %cst_4 = arith.constant 6.250000e-02 : f32
    %10 = vector.broadcast %cst_4 : f32 to vector<8x8x1xf32>
    %11 = arith.mulf %9, %10 : vector<8x8x1xf32>
    %12 = arith.mulf %2, %2 : vector<8x8x8xf32>
    %cst_5 = arith.constant dense<0.000000e+00> : vector<8x8xf32>
    %13 = vector.multi_reduction <add>, %12, %cst_5 [2] : vector<8x8x8xf32> to vector<8x8xf32>
    %14 = vector.shape_cast %13 : vector<8x8xf32> to vector<8x8x1xf32>
    %15 = arith.mulf %4, %4 : vector<8x8x8xf32>
    %cst_6 = arith.constant dense<0.000000e+00> : vector<8x8xf32>
    %16 = vector.multi_reduction <add>, %15, %cst_6 [2] : vector<8x8x8xf32> to vector<8x8xf32>
    %17 = vector.shape_cast %16 : vector<8x8xf32> to vector<8x8x1xf32>
    %18 = arith.addf %14, %17 : vector<8x8x1xf32>
    %cst_7 = arith.constant 6.250000e-02 : f32
    %19 = vector.broadcast %cst_7 : f32 to vector<8x8x1xf32>
    %20 = arith.mulf %18, %19 : vector<8x8x1xf32>
    %21 = arith.mulf %11, %11 : vector<8x8x1xf32>
    %22 = arith.subf %20, %21 : vector<8x8x1xf32>
    %cst_8 = arith.constant 0.000000e+00 : f32
    %23 = vector.broadcast %cst_8 : f32 to vector<8x8x1xf32>
    %24 = arith.maximumf %22, %23 : vector<8x8x1xf32>
    %cst_9 = arith.constant 9.99999974E-6 : f32
    %25 = vector.broadcast %cst_9 : f32 to vector<8x8x1xf32>
    %26 = arith.addf %24, %25 : vector<8x8x1xf32>
    %27 = math.rsqrt %26 : vector<8x8x1xf32>
    %28 = vector.broadcast %11 : vector<8x8x1xf32> to vector<8x8x8xf32>
    %29 = arith.subf %2, %28 : vector<8x8x8xf32>
    %30 = vector.broadcast %27 : vector<8x8x1xf32> to vector<8x8x8xf32>
    %31 = arith.mulf %29, %30 : vector<8x8x8xf32>
    %32 = arith.truncf %31 : vector<8x8x8xf32> to vector<8x8x8xbf16>
    %33 = vector.broadcast %11 : vector<8x8x1xf32> to vector<8x8x8xf32>
    %34 = arith.subf %4, %33 : vector<8x8x8xf32>
    %35 = vector.broadcast %27 : vector<8x8x1xf32> to vector<8x8x8xf32>
    %36 = arith.mulf %34, %35 : vector<8x8x8xf32>
    %37 = arith.truncf %36 : vector<8x8x8xf32> to vector<8x8x8xbf16>
    %c0_10 = arith.constant 0 : index
    %c0_11 = arith.constant 0 : index
    %38 = vector.load %arg2[%c0_10, %c0_11] : memref<8x8xbf16, #tpu.memory_space<vmem>>, vector<8x8xbf16>
    %c0_12 = arith.constant 0 : index
    %c0_13 = arith.constant 0 : index
    %39 = vector.load %arg3[%c0_12, %c0_13] : memref<8x8xbf16, #tpu.memory_space<vmem>>, vector<8x8xbf16>
    %c0_14 = arith.constant 0 : index
    %c0_15 = arith.constant 0 : index
    %40 = vector.load %arg4[%c0_14, %c0_15] : memref<1x8xf32, #tpu.memory_space<vmem>>, vector<1x8xf32>
    %41 = vector.extract_strided_slice %32 {offsets = [0, 0, 0], sizes = [1, 8, 8], strides = [1, 1, 1]} : vector<8x8x8xbf16> to vector<1x8x8xbf16>
    %42 = vector.shape_cast %41 : vector<1x8x8xbf16> to vector<8x8xbf16>
    %cst_16 = arith.constant dense<0.000000e+00> : vector<8x8xf32>
    %43 = tpu.matmul %42, %38, %cst_16 {dimension_numbers = #tpu.dot_dimension_numbers<[1], [0], [0], [1], [0, 0, 1, 1], [], []>} : vector<8x8xbf16>, vector<8x8xbf16>, vector<8x8xf32> -> vector<8x8xf32>
    %44 = vector.extract_strided_slice %37 {offsets = [0, 0, 0], sizes = [1, 8, 8], strides = [1, 1, 1]} : vector<8x8x8xbf16> to vector<1x8x8xbf16>
    %45 = vector.shape_cast %44 : vector<1x8x8xbf16> to vector<8x8xbf16>
    %cst_17 = arith.constant dense<0.000000e+00> : vector<8x8xf32>
    %46 = tpu.matmul %45, %39, %cst_17 {dimension_numbers = #tpu.dot_dimension_numbers<[1], [0], [0], [1], [0, 0, 1, 1], [], []>} : vector<8x8xbf16>, vector<8x8xbf16>, vector<8x8xf32> -> vector<8x8xf32>
    %47 = arith.addf %43, %46 : vector<8x8xf32>
    %48 = vector.broadcast %40 : vector<1x8xf32> to vector<8x8xf32>
    %49 = arith.addf %47, %48 : vector<8x8xf32>
    %c0_18 = arith.constant 0 : index
    %c0_19 = arith.constant 0 : index
    %c0_20 = arith.constant 0 : index
    %50 = vector.load %arg5[%c0_18, %c0_19, %c0_20] : memref<8x8x8xf32, #tpu.memory_space<vmem>>, vector<1x8x8xf32>
    %51 = vector.shape_cast %50 : vector<1x8x8xf32> to vector<8x8xf32>
    %52 = vector.shape_cast %49 : vector<8x8xf32> to vector<1x8x8xf32>
    tpu.vector_store %arg5[%c0_18, %c0_19, %c0_20], %52 {strides = array<i32>} : memref<8x8x8xf32, #tpu.memory_space<vmem>>, vector<1x8x8xf32>,
    %53 = vector.extract_strided_slice %32 {offsets = [1, 0, 0], sizes = [1, 8, 8], strides = [1, 1, 1]} : vector<8x8x8xbf16> to vector<1x8x8xbf16>
    %54 = vector.shape_cast %53 : vector<1x8x8xbf16> to vector<8x8xbf16>
    %cst_21 = arith.constant dense<0.000000e+00> : vector<8x8xf32>
    %55 = tpu.matmul %54, %38, %cst_21 {dimension_numbers = #tpu.dot_dimension_numbers<[1], [0], [0], [1], [0, 0, 1, 1], [], []>} : vector<8x8xbf16>, vector<8x8xbf16>, vector<8x8xf32> -> vector<8x8xf32>
    %56 = vector.extract_strided_slice %37 {offsets = [1, 0, 0], sizes = [1, 8, 8], strides = [1, 1, 1]} : vector<8x8x8xbf16> to vector<1x8x8xbf16>
    %57 = vector.shape_cast %56 : vector<1x8x8xbf16> to vector<8x8xbf16>
    %cst_22 = arith.constant dense<0.000000e+00> : vector<8x8xf32>
    %58 = tpu.matmul %57, %39, %cst_22 {dimension_numbers = #tpu.dot_dimension_numbers<[1], [0], [0], [1], [0, 0, 1, 1], [], []>} : vector<8x8xbf16>, vector<8x8xbf16>, vector<8x8xf32> -> vector<8x8xf32>
    %59 = arith.addf %55, %58 : vector<8x8xf32>
    %60 = vector.broadcast %40 : vector<1x8xf32> to vector<8x8xf32>
    %61 = arith.addf %59, %60 : vector<8x8xf32>
    %c1 = arith.constant 1 : index
    %c0_23 = arith.constant 0 : index
    %c0_24 = arith.constant 0 : index
    %62 = vector.load %arg5[%c1, %c0_23, %c0_24] : memref<8x8x8xf32, #tpu.memory_space<vmem>>, vector<1x8x8xf32>
    %63 = vector.shape_cast %62 : vector<1x8x8xf32> to vector<8x8xf32>
    %64 = vector.shape_cast %61 : vector<8x8xf32> to vector<1x8x8xf32>
    tpu.vector_store %arg5[%c1, %c0_23, %c0_24], %64 {strides = array<i32>} : memref<8x8x8xf32, #tpu.memory_space<vmem>>, vector<1x8x8xf32>,
    %65 = vector.extract_strided_slice %32 {offsets = [2, 0, 0], sizes = [1, 8, 8], strides = [1, 1, 1]} : vector<8x8x8xbf16> to vector<1x8x8xbf16>
    %66 = vector.shape_cast %65 : vector<1x8x8xbf16> to vector<8x8xbf16>
    %cst_25 = arith.constant dense<0.000000e+00> : vector<8x8xf32>
    %67 = tpu.matmul %66, %38, %cst_25 {dimension_numbers = #tpu.dot_dimension_numbers<[1], [0], [0], [1], [0, 0, 1, 1], [], []>} : vector<8x8xbf16>, vector<8x8xbf16>, vector<8x8xf32> -> vector<8x8xf32>
    %68 = vector.extract_strided_slice %37 {offsets = [2, 0, 0], sizes = [1, 8, 8], strides = [1, 1, 1]} : vector<8x8x8xbf16> to vector<1x8x8xbf16>
    %69 = vector.shape_cast %68 : vector<1x8x8xbf16> to vector<8x8xbf16>
    %cst_26 = arith.constant dense<0.000000e+00> : vector<8x8xf32>
    %70 = tpu.matmul %69, %39, %cst_26 {dimension_numbers = #tpu.dot_dimension_numbers<[1], [0], [0], [1], [0, 0, 1, 1], [], []>} : vector<8x8xbf16>, vector<8x8xbf16>, vector<8x8xf32> -> vector<8x8xf32>
    %71 = arith.addf %67, %70 : vector<8x8xf32>
    %72 = vector.broadcast %40 : vector<1x8xf32> to vector<8x8xf32>
    %73 = arith.addf %71, %72 : vector<8x8xf32>
    %c2 = arith.constant 2 : index
    %c0_27 = arith.constant 0 : index
    %c0_28 = arith.constant 0 : index
    %74 = vector.load %arg5[%c2, %c0_27, %c0_28] : memref<8x8x8xf32, #tpu.memory_space<vmem>>, vector<1x8x8xf32>
    %75 = vector.shape_cast %74 : vector<1x8x8xf32> to vector<8x8xf32>
    %76 = vector.shape_cast %73 : vector<8x8xf32> to vector<1x8x8xf32>
    tpu.vector_store %arg5[%c2, %c0_27, %c0_28], %76 {strides = array<i32>} : memref<8x8x8xf32, #tpu.memory_space<vmem>>, vector<1x8x8xf32>,
    %77 = vector.extract_strided_slice %32 {offsets = [3, 0, 0], sizes = [1, 8, 8], strides = [1, 1, 1]} : vector<8x8x8xbf16> to vector<1x8x8xbf16>
    %78 = vector.shape_cast %77 : vector<1x8x8xbf16> to vector<8x8xbf16>
    %cst_29 = arith.constant dense<0.000000e+00> : vector<8x8xf32>
    %79 = tpu.matmul %78, %38, %cst_29 {dimension_numbers = #tpu.dot_dimension_numbers<[1], [0], [0], [1], [0, 0, 1, 1], [], []>} : vector<8x8xbf16>, vector<8x8xbf16>, vector<8x8xf32> -> vector<8x8xf32>
    %80 = vector.extract_strided_slice %37 {offsets = [3, 0, 0], sizes = [1, 8, 8], strides = [1, 1, 1]} : vector<8x8x8xbf16> to vector<1x8x8xbf16>
    %81 = vector.shape_cast %80 : vector<1x8x8xbf16> to vector<8x8xbf16>
    %cst_30 = arith.constant dense<0.000000e+00> : vector<8x8xf32>
    %82 = tpu.matmul %81, %39, %cst_30 {dimension_numbers = #tpu.dot_dimension_numbers<[1], [0], [0], [1], [0, 0, 1, 1], [], []>} : vector<8x8xbf16>, vector<8x8xbf16>, vector<8x8xf32> -> vector<8x8xf32>
    %83 = arith.addf %79, %82 : vector<8x8xf32>
    %84 = vector.broadcast %40 : vector<1x8xf32> to vector<8x8xf32>
    %85 = arith.addf %83, %84 : vector<8x8xf32>
    %c3 = arith.constant 3 : index
    %c0_31 = arith.constant 0 : index
    %c0_32 = arith.constant 0 : index
    %86 = vector.load %arg5[%c3, %c0_31, %c0_32] : memref<8x8x8xf32, #tpu.memory_space<vmem>>, vector<1x8x8xf32>
    %87 = vector.shape_cast %86 : vector<1x8x8xf32> to vector<8x8xf32>
    %88 = vector.shape_cast %85 : vector<8x8xf32> to vector<1x8x8xf32>
    tpu.vector_store %arg5[%c3, %c0_31, %c0_32], %88 {strides = array<i32>} : memref<8x8x8xf32, #tpu.memory_space<vmem>>, vector<1x8x8xf32>,
    %89 = vector.extract_strided_slice %32 {offsets = [4, 0, 0], sizes = [1, 8, 8], strides = [1, 1, 1]} : vector<8x8x8xbf16> to vector<1x8x8xbf16>
    %90 = vector.shape_cast %89 : vector<1x8x8xbf16> to vector<8x8xbf16>
    %cst_33 = arith.constant dense<0.000000e+00> : vector<8x8xf32>
    %91 = tpu.matmul %90, %38, %cst_33 {dimension_numbers = #tpu.dot_dimension_numbers<[1], [0], [0], [1], [0, 0, 1, 1], [], []>} : vector<8x8xbf16>, vector<8x8xbf16>, vector<8x8xf32> -> vector<8x8xf32>
    %92 = vector.extract_strided_slice %37 {offsets = [4, 0, 0], sizes = [1, 8, 8], strides = [1, 1, 1]} : vector<8x8x8xbf16> to vector<1x8x8xbf16>
    %93 = vector.shape_cast %92 : vector<1x8x8xbf16> to vector<8x8xbf16>
    %cst_34 = arith.constant dense<0.000000e+00> : vector<8x8xf32>
    %94 = tpu.matmul %93, %39, %cst_34 {dimension_numbers = #tpu.dot_dimension_numbers<[1], [0], [0], [1], [0, 0, 1, 1], [], []>} : vector<8x8xbf16>, vector<8x8xbf16>, vector<8x8xf32> -> vector<8x8xf32>
    %95 = arith.addf %91, %94 : vector<8x8xf32>
    %96 = vector.broadcast %40 : vector<1x8xf32> to vector<8x8xf32>
    %97 = arith.addf %95, %96 : vector<8x8xf32>
    %c4 = arith.constant 4 : index
    %c0_35 = arith.constant 0 : index
    %c0_36 = arith.constant 0 : index
    %98 = vector.load %arg5[%c4, %c0_35, %c0_36] : memref<8x8x8xf32, #tpu.memory_space<vmem>>, vector<1x8x8xf32>
    %99 = vector.shape_cast %98 : vector<1x8x8xf32> to vector<8x8xf32>
    %100 = vector.shape_cast %97 : vector<8x8xf32> to vector<1x8x8xf32>
    tpu.vector_store %arg5[%c4, %c0_35, %c0_36], %100 {strides = array<i32>} : memref<8x8x8xf32, #tpu.memory_space<vmem>>, vector<1x8x8xf32>,
    %101 = vector.extract_strided_slice %32 {offsets = [5, 0, 0], sizes = [1, 8, 8], strides = [1, 1, 1]} : vector<8x8x8xbf16> to vector<1x8x8xbf16>
    %102 = vector.shape_cast %101 : vector<1x8x8xbf16> to vector<8x8xbf16>
    %cst_37 = arith.constant dense<0.000000e+00> : vector<8x8xf32>
    %103 = tpu.matmul %102, %38, %cst_37 {dimension_numbers = #tpu.dot_dimension_numbers<[1], [0], [0], [1], [0, 0, 1, 1], [], []>} : vector<8x8xbf16>, vector<8x8xbf16>, vector<8x8xf32> -> vector<8x8xf32>
    %104 = vector.extract_strided_slice %37 {offsets = [5, 0, 0], sizes = [1, 8, 8], strides = [1, 1, 1]} : vector<8x8x8xbf16> to vector<1x8x8xbf16>
    %105 = vector.shape_cast %104 : vector<1x8x8xbf16> to vector<8x8xbf16>
    %cst_38 = arith.constant dense<0.000000e+00> : vector<8x8xf32>
    %106 = tpu.matmul %105, %39, %cst_38 {dimension_numbers = #tpu.dot_dimension_numbers<[1], [0], [0], [1], [0, 0, 1, 1], [], []>} : vector<8x8xbf16>, vector<8x8xbf16>, vector<8x8xf32> -> vector<8x8xf32>
    %107 = arith.addf %103, %106 : vector<8x8xf32>
    %108 = vector.broadcast %40 : vector<1x8xf32> to vector<8x8xf32>
    %109 = arith.addf %107, %108 : vector<8x8xf32>
    %c5 = arith.constant 5 : index
    %c0_39 = arith.constant 0 : index
    %c0_40 = arith.constant 0 : index
    %110 = vector.load %arg5[%c5, %c0_39, %c0_40] : memref<8x8x8xf32, #tpu.memory_space<vmem>>, vector<1x8x8xf32>
    %111 = vector.shape_cast %110 : vector<1x8x8xf32> to vector<8x8xf32>
    %112 = vector.shape_cast %109 : vector<8x8xf32> to vector<1x8x8xf32>
    tpu.vector_store %arg5[%c5, %c0_39, %c0_40], %112 {strides = array<i32>} : memref<8x8x8xf32, #tpu.memory_space<vmem>>, vector<1x8x8xf32>,
    %113 = vector.extract_strided_slice %32 {offsets = [6, 0, 0], sizes = [1, 8, 8], strides = [1, 1, 1]} : vector<8x8x8xbf16> to vector<1x8x8xbf16>
    %114 = vector.shape_cast %113 : vector<1x8x8xbf16> to vector<8x8xbf16>
    %cst_41 = arith.constant dense<0.000000e+00> : vector<8x8xf32>
    %115 = tpu.matmul %114, %38, %cst_41 {dimension_numbers = #tpu.dot_dimension_numbers<[1], [0], [0], [1], [0, 0, 1, 1], [], []>} : vector<8x8xbf16>, vector<8x8xbf16>, vector<8x8xf32> -> vector<8x8xf32>
    %116 = vector.extract_strided_slice %37 {offsets = [6, 0, 0], sizes = [1, 8, 8], strides = [1, 1, 1]} : vector<8x8x8xbf16> to vector<1x8x8xbf16>
    %117 = vector.shape_cast %116 : vector<1x8x8xbf16> to vector<8x8xbf16>
    %cst_42 = arith.constant dense<0.000000e+00> : vector<8x8xf32>
    %118 = tpu.matmul %117, %39, %cst_42 {dimension_numbers = #tpu.dot_dimension_numbers<[1], [0], [0], [1], [0, 0, 1, 1], [], []>} : vector<8x8xbf16>, vector<8x8xbf16>, vector<8x8xf32> -> vector<8x8xf32>
    %119 = arith.addf %115, %118 : vector<8x8xf32>
    %120 = vector.broadcast %40 : vector<1x8xf32> to vector<8x8xf32>
    %121 = arith.addf %119, %120 : vector<8x8xf32>
    %c6 = arith.constant 6 : index
    %c0_43 = arith.constant 0 : index
    %c0_44 = arith.constant 0 : index
    %122 = vector.load %arg5[%c6, %c0_43, %c0_44] : memref<8x8x8xf32, #tpu.memory_space<vmem>>, vector<1x8x8xf32>
    %123 = vector.shape_cast %122 : vector<1x8x8xf32> to vector<8x8xf32>
    %124 = vector.shape_cast %121 : vector<8x8xf32> to vector<1x8x8xf32>
    tpu.vector_store %arg5[%c6, %c0_43, %c0_44], %124 {strides = array<i32>} : memref<8x8x8xf32, #tpu.memory_space<vmem>>, vector<1x8x8xf32>,
    %125 = vector.extract_strided_slice %32 {offsets = [7, 0, 0], sizes = [1, 8, 8], strides = [1, 1, 1]} : vector<8x8x8xbf16> to vector<1x8x8xbf16>
    %126 = vector.shape_cast %125 : vector<1x8x8xbf16> to vector<8x8xbf16>
    %cst_45 = arith.constant dense<0.000000e+00> : vector<8x8xf32>
    %127 = tpu.matmul %126, %38, %cst_45 {dimension_numbers = #tpu.dot_dimension_numbers<[1], [0], [0], [1], [0, 0, 1, 1], [], []>} : vector<8x8xbf16>, vector<8x8xbf16>, vector<8x8xf32> -> vector<8x8xf32>
    %128 = vector.extract_strided_slice %37 {offsets = [7, 0, 0], sizes = [1, 8, 8], strides = [1, 1, 1]} : vector<8x8x8xbf16> to vector<1x8x8xbf16>
    %129 = vector.shape_cast %128 : vector<1x8x8xbf16> to vector<8x8xbf16>
    %cst_46 = arith.constant dense<0.000000e+00> : vector<8x8xf32>
    %130 = tpu.matmul %129, %39, %cst_46 {dimension_numbers = #tpu.dot_dimension_numbers<[1], [0], [0], [1], [0, 0, 1, 1], [], []>} : vector<8x8xbf16>, vector<8x8xbf16>, vector<8x8xf32> -> vector<8x8xf32>
    %131 = arith.addf %127, %130 : vector<8x8xf32>
    %132 = vector.broadcast %40 : vector<1x8xf32> to vector<8x8xf32>
    %133 = arith.addf %131, %132 : vector<8x8xf32>
    %c7 = arith.constant 7 : index
    %c0_47 = arith.constant 0 : index
    %c0_48 = arith.constant 0 : index
    %134 = vector.load %arg5[%c7, %c0_47, %c0_48] : memref<8x8x8xf32, #tpu.memory_space<vmem>>, vector<1x8x8xf32>
    %135 = vector.shape_cast %134 : vector<1x8x8xf32> to vector<8x8xf32>
    %136 = vector.shape_cast %133 : vector<8x8xf32> to vector<1x8x8xf32>
    tpu.vector_store %arg5[%c7, %c0_47, %c0_48], %136 {strides = array<i32>} : memref<8x8x8xf32, #tpu.memory_space<vmem>>, vector<1x8x8xf32>,
    return
  }
  func.func @transform_0(%arg0: i32) -> (i32, i32, i32, i32) {
    %c0_i32 = arith.constant 0 : i32
    %c0_i32_0 = arith.constant 0 : i32
    %c0_i32_1 = arith.constant 0 : i32
    %c0_i32_2 = arith.constant 0 : i32
    return %arg0, %c0_i32, %c0_i32_0, %c0_i32_1 : i32, i32, i32, i32
  }
  func.func @transform_1(%arg0: i32) -> (i32, i32) {
    %c0_i32 = arith.constant 0 : i32
    %c0_i32_0 = arith.constant 0 : i32
    %c0_i32_1 = arith.constant 0 : i32
    return %c0_i32, %c0_i32_0 : i32, i32
  }
  func.func @transform_2(%arg0: i32) -> (i32, i32) {
    %c0_i32 = arith.constant 0 : i32
    %c0_i32_0 = arith.constant 0 : i32
    %c0_i32_1 = arith.constant 0 : i32
    return %c0_i32, %c0_i32_0 : i32, i32
  }
  func.func @transform_3(%arg0: i32) -> (i32, i32) {
    %c0_i32 = arith.constant 0 : i32
    %c0_i32_0 = arith.constant 0 : i32
    %c0_i32_1 = arith.constant 0 : i32
    return %c0_i32, %c0_i32_0 : i32, i32
  }
  func.func @transform_4(%arg0: i32) -> (i32, i32, i32) {
    %c0_i32 = arith.constant 0 : i32
    %c0_i32_0 = arith.constant 0 : i32
    %c0_i32_1 = arith.constant 0 : i32
    return %arg0, %c0_i32, %c0_i32_0 : i32, i32, i32
  }
}

</mosaic_0001>

<bundles_post_ra>
// kernel: tpu_custom_call.1
= control target key start
LH: loop header
LB: loop body
LE: loop exit
PB: predicated region body
PF: predicated region fallthrough
CT: control target
= control target key end

     0   :  { %s1463_s15 = smov 0   ;;  %s1787_s0 = inlined_call_operand.vmem [shape: f32[16,2,8,8], index: 0, kind: input, shape index: {}]   ;;  %s1788_s1 = inlined_call_operand.vmem [shape: bf16[8,8], index: 1, kind: input, shape index: {}]   ;;  %s1789_s2 = inlined_call_operand.vmem [shape: bf16[8,8], index: 2, kind: input, shape index: {}]   ;;  %s1790_s3 = inlined_call_operand.vmem [shape: f32[1,8], index: 3, kind: input, shape index: {}]   ;;  %s1791_s4 = inlined_call_operand.vmem [shape: f32[16,8,8], index: 4, kind: output, shape index: {}]  }
   0x1 LB: > { %s1237_s16 = sadd.s32 4294967295, %s1434_s15   ;;  %p1241_p0 = scmp.ge.s32.totalorder %s1434_s15, 1  ;;  %s1434_s15 = sphi %s1463_s15, %s14_s15  }
   0x2   : > { %p164_p1 = scmp.lt.s32.totalorder %s1434_s15, 3 }
   0x4   : > { %p165_p2 = pnand %p1241_p0, %p164_p1 }
   0x5   : > { %s1242_s17 = sshll.u32 (!%p165_p2), %s1237_s16, 3 }
   0x6   : > { %168 = sbr.rel (%p165_p2) target bundleno = 443 (0x1bb), region = 36  ;;  %p192_p3 = scmp.lt.s32.totalorder (!%p165_p2), %s1242_s17, 15 }
   0xb   : > { %s1793_s17 = smov (!%p192_p3, %s1242_s17), 15  ;;  %vm221_vm0 = vcmask 64512   ;;  %v455_v46 = vld [vmem:[%s1789_s2] sm:$0xf]  ;;  %vm460_vm1 = vcmask 1043456   ;;  %v1436_v49 = vmov 0.0  }
   0xc   : > { %s1273_s18 = sshll.u32 %s1793_s17, 4  ;;  %v454_v47 = vld [vmem:[%s1788_s1] sm:$0xf]  ;;  %1306 = vmatprep.subr.bf16.mxu0 %v1436_v49  ;;  %1312 = vmatprep.subr.bf16.mxu1 %v1436_v49  ;;  %v1582_v50 = vsel %vm460_vm1, %v455_v46, 0  ;;  %vm1437_vm2 = vmmov 0   ;;  %s1246_s26 = sshll.u32 %s1793_s17, 3 }
   0xd   : > { %s1477_s21 = scalar_lea.vmem %s1787_s0, %s1273_s18  ;;  %v1584_v51 = vsel %vm460_vm1, %v454_v47, 0  ;;  %1307 = vmatpush3.bf16.msra.mxu0 %v1582_v50  ;;  %1308 = vmatprep.mubr.msk.bf16.mxu0 %vm1437_vm2, %v1436_v49  ;;  %s1758_s5 = scalar_lea.vmem %s1791_s4, %s1246_s26 }
   0xe   : > { %v1480_v0 = vld [vmem:[%s1477_s21] sm:$0xff]  ;;  %v1483_v1 = vld [vmem:[%s1477_s21 + $0x8] sm:$0xff]  ;;  %v1495_v7 = vld [vmem:[%s1477_s21 + $0x10] sm:$0xff]  ;;  %1313 = vmatpush3.bf16.msra.mxu1 %v1584_v51  ;;  %1318 = vmatprep.subr.bf16.mxu0 %v1436_v49 }
   0xf   : > { %v222_v2 = vsel %vm221_vm0, %v1480_v0, 0.0  ;;  %v286_v3 = vmul.f32 %v1480_v0, %v1480_v0  ;;  %v318_v4 = vmul.f32 %v1483_v1, %v1483_v1  ;;  %v246_v6 = vsel %vm221_vm0, %v1483_v1, 0.0  ;;  %v1499_v9 = vld [vmem:[%s1477_s21 + $0x18] sm:$0xff]  ;;  %v1511_v15 = vld [vmem:[%s1477_s21 + $0x20] sm:$0xff]  ;;  %v1515_v17 = vld [vmem:[%s1477_s21 + $0x28] sm:$0xff]  ;;  %1314 = vmatprep.mubr.msk.bf16.mxu1 %vm1437_vm2, %v1436_v49  ;;  %1324 = vmatprep.subr.bf16.mxu1 %v1436_v49 }
  0x10   : > { %223 = vadd.xlane.f32.xlu0 %v222_v2  ;;  %v225_v10 = vsel %vm221_vm0, %v1495_v7, 0.0  ;;  %v287_v11 = vmul.f32 %v1495_v7, %v1495_v7  ;;  %v249_v12 = vsel %vm221_vm0, %v1499_v9, 0.0  ;;  %v319_v13 = vmul.f32 %v1499_v9, %v1499_v9  ;;  %v1527_v23 = vld [vmem:[%s1477_s21 + $0x30] sm:$0xff]  ;;  %v1531_v25 = vld [vmem:[%s1477_s21 + $0x38] sm:$0xff]  ;;  %v1543_v31 = vld [vmem:[%s1477_s21 + $0x40] sm:$0xff] }
  0x11   : > { %v294_v5 = vsel %vm221_vm0, %v286_v3, 0.0  ;;  %v326_v8 = vsel %vm221_vm0, %v318_v4, 0.0  ;;  %v228_v18 = vsel %vm221_vm0, %v1511_v15, 0.0  ;;  %v288_v19 = vmul.f32 %v1511_v15, %v1511_v15  ;;  %v1547_v33 = vld [vmem:[%s1477_s21 + $0x48] sm:$0xff]  ;;  %v1559_v39 = vld [vmem:[%s1477_s21 + $0x50] sm:$0xff]  ;;  %v1563_v41 = vld [vmem:[%s1477_s21 + $0x58] sm:$0xff] }
  0x12   : > { %295 = vadd.xlane.f32.xlu1 %v294_v5  ;;  %v297_v14 = vsel %vm221_vm0, %v287_v11, 0.0  ;;  %v329_v16 = vsel %vm221_vm0, %v319_v13, 0.0  ;;  %v252_v20 = vsel %vm221_vm0, %v1515_v17, 0.0  ;;  %v320_v21 = vmul.f32 %v1515_v17, %v1515_v17  ;;  %v1587_v52 = vld [vmem:[%s1477_s21 + $0x60] sm:$0xff]  ;;  %v1594_v54 = vld [vmem:[%s1477_s21 + $0x68] sm:$0xff]  ;;  %v1611_v60 = vld [vmem:[%s1477_s21 + $0x70] sm:$0xff] }
  0x13   : > { %v300_v22 = vsel %vm221_vm0, %v288_v19, 0.0  ;;  %v231_v26 = vsel %vm221_vm0, %v1527_v23, 0.0  ;;  %v289_v27 = vmul.f32 %v1527_v23, %v1527_v23  ;;  %v255_v28 = vsel %vm221_vm0, %v1531_v25, 0.0  ;;  %v1615_v62 = vld [vmem:[%s1477_s21 + $0x78] sm:$0xff] }
  0x14   : > { %247 = vadd.xlane.f32.xlu0 %v246_v6  ;;  %v332_v24 = vsel %vm221_vm0, %v320_v21, 0.0  ;;  %v321_v29 = vmul.f32 %v1531_v25, %v1531_v25  ;;  %v234_v34 = vsel %vm221_vm0, %v1543_v31, 0.0  ;;  %v290_v35 = vmul.f32 %v1543_v31, %v1543_v31 }
  0x15   : > { %v303_v30 = vsel %vm221_vm0, %v289_v27, 0.0  ;;  %v258_v36 = vsel %vm221_vm0, %v1547_v33, 0.0  ;;  %v322_v37 = vmul.f32 %v1547_v33, %v1547_v33  ;;  %v237_v42 = vsel %vm221_vm0, %v1559_v39, 0.0 }
  0x16   : > { %327 = vadd.xlane.f32.xlu1 %v326_v8  ;;  %v335_v32 = vsel %vm221_vm0, %v321_v29, 0.0  ;;  %v306_v38 = vsel %vm221_vm0, %v290_v35, 0.0  ;;  %v291_v43 = vmul.f32 %v1559_v39, %v1559_v39  ;;  %v261_v44 = vsel %vm221_vm0, %v1563_v41, 0.0 }
  0x17   : > { %v338_v40 = vsel %vm221_vm0, %v322_v37, 0.0  ;;  %v323_v45 = vmul.f32 %v1563_v41, %v1563_v41  ;;  %v240_v55 = vsel %vm221_vm0, %v1587_v52, 0.0  ;;  %v292_v56 = vmul.f32 %v1587_v52, %v1587_v52 }
  0x18   : > { %226 = vadd.xlane.f32.xlu0 %v225_v10  ;;  %v309_v48 = vsel %vm221_vm0, %v291_v43, 0.0  ;;  %v264_v57 = vsel %vm221_vm0, %v1594_v54, 0.0  ;;  %v324_v58 = vmul.f32 %v1594_v54, %v1594_v54  ;;  %v243_v63 = vsel %vm221_vm0, %v1611_v60, 0.0 }
  0x19   : > { %v341_v53 = vsel %vm221_vm0, %v323_v45, 0.0  ;;  %v312_v59 = vsel %vm221_vm0, %v292_v56, 0.0  ;;  %v293_v2 = vmul.f32 %v1611_v60, %v1611_v60  ;;  %v267_v3 = vsel %vm221_vm0, %v1615_v62, 0.0 }
  0x1a   : > { %250 = vadd.xlane.f32.xlu1 %v249_v12  ;;  %v344_v61 = vsel %vm221_vm0, %v324_v58, 0.0  ;;  %v325_v4 = vmul.f32 %v1615_v62, %v1615_v62 }
  0x1b   : > { %v315_v5 = vsel %vm221_vm0, %v293_v2, 0.0 }
  0x1c   : > { %298 = vadd.xlane.f32.xlu0 %v297_v14  ;;  %v347_v6 = vsel %vm221_vm0, %v325_v4, 0.0 }
  0x1e   : > { %330 = vadd.xlane.f32.xlu1 %v329_v16 }
  0x20   : > { %229 = vadd.xlane.f32.xlu0 %v228_v18 }
  0x22   : > { %253 = vadd.xlane.f32.xlu1 %v252_v20 }
  0x24   : > { %301 = vadd.xlane.f32.xlu0 %v300_v22 }
  0x26   : > { %333 = vadd.xlane.f32.xlu1 %v332_v24 }
  0x28   : > { %232 = vadd.xlane.f32.xlu0 %v231_v26 }
  0x2a   : > { %256 = vadd.xlane.f32.xlu1 %v255_v28 }
  0x2c   : > { %304 = vadd.xlane.f32.xlu0 %v303_v30 }
  0x2e   : > { %336 = vadd.xlane.f32.xlu1 %v335_v32 }
  0x30   : > { %235 = vadd.xlane.f32.xlu0 %v234_v34 }
  0x32   : > { %259 = vadd.xlane.f32.xlu1 %v258_v36 }
  0x34   : > { %307 = vadd.xlane.f32.xlu0 %v306_v38 }
  0x36   : > { %339 = vadd.xlane.f32.xlu1 %v338_v40 }
  0x38   : > { %238 = vadd.xlane.f32.xlu0 %v237_v42 }
  0x3a   : > { %262 = vadd.xlane.f32.xlu1 %v261_v44 }
  0x3c   : > { %310 = vadd.xlane.f32.xlu0 %v309_v48 }
  0x3e   : > { %342 = vadd.xlane.f32.xlu1 %v341_v53 }
  0x40   : > { %241 = vadd.xlane.f32.xlu0 %v240_v55 }
  0x42   : > { %265 = vadd.xlane.f32.xlu1 %v264_v57 }
  0x44   : > { %313 = vadd.xlane.f32.xlu0 %v312_v59 }
  0x46   : > { %345 = vadd.xlane.f32.xlu1 %v344_v61 }
  0x48   : > { %244 = vadd.xlane.f32.xlu0 %v243_v63 }
  0x4a   : > { %268 = vadd.xlane.f32.xlu1 %v267_v3 }
  0x4c   : > { %316 = vadd.xlane.f32.xlu0 %v315_v5 }
  0x4e   : > { %348 = vadd.xlane.f32.xlu1 %v347_v6 }
  0x99   : > { %v224_v8 = vpop.xlane.xlu0 %223 }
  0x9b   : > { %v296_v10 = vpop.xlane.xlu1 %295 }
  0x9d   : > { %v248_v11 = vpop.xlane.xlu0 %247 }
  0x9e   : > { %v270_v12 = vadd.f32 %v248_v11, %v224_v8 }
  0x9f   : > { %v328_v13 = vpop.xlane.xlu1 %327 }
  0xa0   : > { %v278_v14 = vmul.f32 0.0625, %v270_v12  ;;  %v350_v16 = vadd.f32 %v328_v13, %v296_v10 }
  0xa1   : > { %v227_v18 = vpop.xlane.xlu0 %226 }
  0xa2   : > { %v358_v19 = vmul.f32 0.0625, %v350_v16  ;;  %v366_v20 = vmul.f32 %v278_v14, %v278_v14  ;;  %v406_v2 = vsub.f32 %v1480_v0, %v278_v14  ;;  %v430_v3 = vsub.f32 %v1483_v1, %v278_v14 }
  0xa3   : > { %v251_v21 = vpop.xlane.xlu1 %250 }
  0xa4   : > { %v374_v22 = vsub.f32 %v358_v19, %v366_v20  ;;  %v271_v24 = vadd.f32 %v251_v21, %v227_v18 }
  0xa5   : > { %v299_v26 = vpop.xlane.xlu0 %298 }
  0xa6   : > { %v382_v27 = vmax.f32 %v374_v22, 0.0  ;;  %v1627_v28 = vmul.f32 0.0625, %v271_v24 }
  0xa7   : > { %v331_v29 = vpop.xlane.xlu1 %330 }
  0xa8   : > { %v390_v30 = vadd.f32 1e-05, %v382_v27  ;;  %v351_v32 = vadd.f32 %v331_v29, %v299_v26  ;;  %v367_v35 = vmul.f32 %v1627_v28, %v1627_v28  ;;  %v407_v22 = vsub.f32 %v1495_v7, %v1627_v28 }
  0xa9   : > { %v230_v34 = vpop.xlane.xlu0 %229  ;;  %v431_v24 = vsub.f32 %v1499_v9, %v1627_v28 }
  0xaa   : > { %1412 = vrsqrt.f32 %v390_v30  ;;  %v359_v36 = vmul.f32 0.0625, %v351_v32 }
  0xab   : > { %v254_v37 = vpop.xlane.xlu1 %253 }
  0xac   : > { %v272_v38 = vadd.f32 %v254_v37, %v230_v34  ;;  %v375_v40 = vsub.f32 %v359_v36, %v367_v35 }
  0xad   : > { %v302_v42 = vpop.xlane.xlu0 %301 }
  0xae   : > { %v1631_v43 = vmul.f32 0.0625, %v272_v38  ;;  %v383_v44 = vmax.f32 %v375_v40, 0.0 }
  0xaf   : > { %v334_v45 = vpop.xlane.xlu1 %333 }
  0xb0   : > { %v352_v46 = vadd.f32 %v334_v45, %v302_v42  ;;  %v391_v47 = vadd.f32 1e-05, %v383_v44  ;;  %v368_v53 = vmul.f32 %v1631_v43, %v1631_v43 }
  0xb1   : > { %v233_v48 = vpop.xlane.xlu0 %232 }
  0xb2   : > { %v360_v55 = vmul.f32 0.0625, %v352_v46  ;;  %1414 = vrsqrt.f32 %v391_v47  ;;  %v408_v47 = vsub.f32 %v1511_v15, %v1631_v43 }
  0xb3   : > { %v257_v56 = vpop.xlane.xlu1 %256 }
  0xb4   : > { %v376_v57 = vsub.f32 %v360_v55, %v368_v53  ;;  %v273_v58 = vadd.f32 %v257_v56, %v233_v48  ;;  %v432_v48 = vsub.f32 %v1515_v17, %v1631_v43 }
  0xb5   : > { %v305_v59 = vpop.xlane.xlu0 %304 }
  0xb6   : > { %v384_v61 = vmax.f32 %v376_v57, 0.0  ;;  %v1637_v4 = vmul.f32 0.0625, %v273_v58 }
  0xb7   : > { %v1413_v63 = vpop.eup %1412  ;;  %v337_v5 = vpop.xlane.xlu1 %336 }
  0xb8   : > { %v392_v6 = vadd.f32 1e-05, %v384_v61  ;;  %v353_v8 = vadd.f32 %v337_v5, %v305_v59  ;;  %v438_v11 = vmul.f32 %v1413_v63, %v430_v3  ;;  %v414_v12 = vmul.f32 %v1413_v63, %v406_v2 }
  0xb9   : > { %v236_v10 = vpop.xlane.xlu0 %235  ;;  %v369_v13 = vmul.f32 %v1637_v4, %v1637_v4 }
  0xba   : > { %1416 = vrsqrt.f32 %v392_v6  ;;  %v361_v16 = vmul.f32 0.0625, %v353_v8  ;;  %v446_v19 = vpack.c.bf16 %v438_v11, %v438_v11  ;;  %v422_v20 = vpack.c.bf16 %v414_v12, %v414_v12 }
  0xbb   : > { %v260_v18 = vpop.xlane.xlu1 %259  ;;  %v433_v11 = vsub.f32 %v1531_v25, %v1637_v4 }
  0xbc   : > { %v274_v21 = vadd.f32 %v260_v18, %v236_v10  ;;  %v377_v0 = vsub.f32 %v361_v16, %v369_v13  ;;  %1309 = vmatmul.mubr.msk.bf16.vlgmr.msra.gmra.mxu0 %vm221_vm0, %v446_v19  ;;  %1315 = vmatmul.mubr.msk.bf16.vlgmr.msra.gmra.mxu1 %vm221_vm0, %v422_v20  ;;  %v409_v10 = vsub.f32 %v1527_v23, %v1637_v4 }
  0xbd   : > { %v308_v1 = vpop.xlane.xlu0 %307  ;;  %1319 = vmatpush3.bf16.msra.mxu0 %v1582_v50  ;;  %1325 = vmatpush3.bf16.msra.mxu1 %v1584_v51 }
  0xbe   : > { %v1643_v14 = vmul.f32 0.0625, %v274_v21  ;;  %v385_v26 = vmax.f32 %v377_v0, 0.0  ;;  %1320 = vmatprep.mubr.msk.bf16.mxu0 %vm1437_vm2, %v1436_v49  ;;  %1326 = vmatprep.mubr.msk.bf16.mxu1 %vm1437_vm2, %v1436_v49 }
  0xbf   : > { %v340_v27 = vpop.xlane.xlu1 %339  ;;  %v1415_v29 = vpop.eup %1414  ;;  %1330 = vmatprep.subr.bf16.mxu0 %v1436_v49  ;;  %1336 = vmatprep.subr.bf16.mxu1 %v1436_v49 }
  0xc0   : > { %v354_v30 = vadd.f32 %v340_v27, %v308_v1  ;;  %v393_v32 = vadd.f32 1e-05, %v385_v26  ;;  %v439_v7 = vmul.f32 %v1415_v29, %v431_v24  ;;  %v415_v35 = vmul.f32 %v1415_v29, %v407_v22 }
  0xc1   : > { %v239_v34 = vpop.xlane.xlu0 %238  ;;  %v370_v9 = vmul.f32 %v1643_v14, %v1643_v14 }
  0xc2   : > { %v362_v28 = vmul.f32 0.0625, %v354_v30  ;;  %1418 = vrsqrt.f32 %v393_v32  ;;  %v447_v37 = vpack.c.bf16 %v439_v7, %v439_v7  ;;  %v423_v38 = vpack.c.bf16 %v415_v35, %v415_v35 }
  0xc3   : > { %v263_v36 = vpop.xlane.xlu1 %262  ;;  %v410_v32 = vsub.f32 %v1543_v31, %v1643_v14 }
  0xc4   : > { %v378_v40 = vsub.f32 %v362_v28, %v370_v9  ;;  %v275_v42 = vadd.f32 %v263_v36, %v239_v34  ;;  %1321 = vmatmul.mubr.msk.bf16.vlgmr.msra.gmra.mxu0 %vm221_vm0, %v447_v37  ;;  %1327 = vmatmul.mubr.msk.bf16.vlgmr.msra.gmra.mxu1 %vm221_vm0, %v423_v38  ;;  %v434_v34 = vsub.f32 %v1547_v33, %v1643_v14 }
  0xc5   : > { %v311_v44 = vpop.xlane.xlu0 %310  ;;  %1331 = vmatpush3.bf16.msra.mxu0 %v1582_v50  ;;  %1337 = vmatpush3.bf16.msra.mxu1 %v1584_v51 }
  0xc6   : > { %v386_v45 = vmax.f32 %v378_v40, 0.0  ;;  %v1667_v53 = vmul.f32 0.0625, %v275_v42  ;;  %1332 = vmatprep.mubr.msk.bf16.mxu0 %vm1437_vm2, %v1436_v49  ;;  %1338 = vmatprep.mubr.msk.bf16.mxu1 %vm1437_vm2, %v1436_v49 }
  0xc7   : > { %v1417_v46 = vpop.eup %1416  ;;  %v343_v55 = vpop.xlane.xlu1 %342  ;;  %1342 = vmatprep.subr.bf16.mxu0 %v1436_v49  ;;  %1348 = vmatprep.subr.bf16.mxu1 %v1436_v49 }
  0xc8   : > { %v394_v56 = vadd.f32 1e-05, %v386_v45  ;;  %v355_v57 = vadd.f32 %v343_v55, %v311_v44  ;;  %v440_v15 = vmul.f32 %v1417_v46, %v432_v48  ;;  %v416_v59 = vmul.f32 %v1417_v46, %v408_v47 }
  0xc9   : > { %v242_v58 = vpop.xlane.xlu0 %241  ;;  %v371_v17 = vmul.f32 %v1667_v53, %v1667_v53  ;;  %v411_v42 = vsub.f32 %v1559_v39, %v1667_v53  ;;  %v435_v44 = vsub.f32 %v1563_v41, %v1667_v53 }
  0xca   : > { %1420 = vrsqrt.f32 %v394_v56  ;;  %v363_v43 = vmul.f32 0.0625, %v355_v57  ;;  %v448_v63 = vpack.c.bf16 %v440_v15, %v440_v15  ;;  %v424_v2 = vpack.c.bf16 %v416_v59, %v416_v59 }
  0xcb   : > { %v266_v61 = vpop.xlane.xlu1 %265 }
  0xcc   : > { %v276_v3 = vadd.f32 %v266_v61, %v242_v58  ;;  %v379_v5 = vsub.f32 %v363_v43, %v371_v17  ;;  %1333 = vmatmul.mubr.msk.bf16.vlgmr.msra.gmra.mxu0 %vm221_vm0, %v448_v63  ;;  %1339 = vmatmul.mubr.msk.bf16.vlgmr.msra.gmra.mxu1 %vm221_vm0, %v424_v2 }
  0xcd   : > { %v314_v6 = vpop.xlane.xlu0 %313  ;;  %1343 = vmatpush3.bf16.msra.mxu0 %v1582_v50  ;;  %1349 = vmatpush3.bf16.msra.mxu1 %v1584_v51 }
  0xce   : > { %v1679_v8 = vmul.f32 0.0625, %v276_v3  ;;  %v387_v12 = vmax.f32 %v379_v5, 0.0  ;;  %1344 = vmatprep.mubr.msk.bf16.mxu0 %vm1437_vm2, %v1436_v49  ;;  %1350 = vmatprep.mubr.msk.bf16.mxu1 %vm1437_vm2, %v1436_v49 }
  0xcf   : > { %v346_v13 = vpop.xlane.xlu1 %345  ;;  %v1419_v16 = vpop.eup %1418  ;;  %1354 = vmatprep.subr.bf16.mxu0 %v1436_v49  ;;  %1360 = vmatprep.subr.bf16.mxu1 %v1436_v49 }
  0xd0   : > { %v356_v18 = vadd.f32 %v346_v13, %v314_v6  ;;  %v395_v19 = vadd.f32 1e-05, %v387_v12  ;;  %v441_v23 = vmul.f32 %v1419_v16, %v433_v11  ;;  %v417_v21 = vmul.f32 %v1419_v16, %v409_v10 }
  0xd1   : > { %v245_v20 = vpop.xlane.xlu0 %244  ;;  %v372_v25 = vmul.f32 %v1679_v8, %v1679_v8  ;;  %v412_v41 = vsub.f32 %v1587_v52, %v1679_v8  ;;  %v436_v53 = vsub.f32 %v1594_v54, %v1679_v8 }
  0xd2   : > { %v364_v4 = vmul.f32 0.0625, %v356_v18  ;;  %1422 = vrsqrt.f32 %v395_v19  ;;  %v449_v1 = vpack.c.bf16 %v441_v23, %v441_v23  ;;  %v425_v22 = vpack.c.bf16 %v417_v21, %v417_v21 }
  0xd3   : > { %v269_v0 = vpop.xlane.xlu1 %268 }
  0xd4   : > { %v380_v24 = vsub.f32 %v364_v4, %v372_v25  ;;  %v277_v26 = vadd.f32 %v269_v0, %v245_v20  ;;  %1345 = vmatmul.mubr.msk.bf16.vlgmr.msra.gmra.mxu0 %vm221_vm0, %v449_v1  ;;  %1351 = vmatmul.mubr.msk.bf16.vlgmr.msra.gmra.mxu1 %vm221_vm0, %v425_v22 }
  0xd5   : > { %1355 = vmatpush3.bf16.msra.mxu0 %v1582_v50  ;;  %1361 = vmatpush3.bf16.msra.mxu1 %v1584_v51  ;;  %v317_v29 = vpop.xlane.xlu0 %316 }
  0xd6   : > { %v388_v27 = vmax.f32 %v380_v24, 0.0  ;;  %v285_v7 = vmul.f32 0.0625, %v277_v26  ;;  %1356 = vmatprep.mubr.msk.bf16.mxu0 %vm1437_vm2, %v1436_v49  ;;  %1362 = vmatprep.mubr.msk.bf16.mxu1 %vm1437_vm2, %v1436_v49 }
  0xd7   : > { %v1421_v30 = vpop.eup %1420  ;;  %v349_v35 = vpop.xlane.xlu1 %348  ;;  %1366 = vmatprep.subr.bf16.mxu0 %v1436_v49  ;;  %1372 = vmatprep.subr.bf16.mxu1 %v1436_v49 }
  0xd8   : > { %v396_v9 = vadd.f32 1e-05, %v388_v27  ;;  %v357_v28 = vadd.f32 %v349_v35, %v317_v29  ;;  %v442_v36 = vmul.f32 %v1421_v30, %v434_v34  ;;  %v418_v37 = vmul.f32 %v1421_v30, %v410_v32 }
  0xd9   : > { %v373_v31 = vmul.f32 %v285_v7, %v285_v7  ;;  %v413_v54 = vsub.f32 %v1611_v60, %v285_v7  ;;  %v437_v17 = vsub.f32 %v1615_v62, %v285_v7 }
  0xda   : > { %1424 = vrsqrt.f32 %v396_v9  ;;  %v365_v38 = vmul.f32 0.0625, %v357_v28  ;;  %v450_v33 = vpack.c.bf16 %v442_v36, %v442_v36  ;;  %v426_v14 = vpack.c.bf16 %v418_v37, %v418_v37 }
  0xdc   : > { %v381_v40 = vsub.f32 %v365_v38, %v373_v31  ;;  %1357 = vmatmul.mubr.msk.bf16.vlgmr.msra.gmra.mxu0 %vm221_vm0, %v450_v33  ;;  %1363 = vmatmul.mubr.msk.bf16.vlgmr.msra.gmra.mxu1 %vm221_vm0, %v426_v14 }
  0xdd   : > { %1367 = vmatpush3.bf16.msra.mxu0 %v1582_v50  ;;  %1373 = vmatpush3.bf16.msra.mxu1 %v1584_v51 }
  0xde   : > { %v389_v45 = vmax.f32 %v381_v40, 0.0  ;;  %1368 = vmatprep.mubr.msk.bf16.mxu0 %vm1437_vm2, %v1436_v49  ;;  %1374 = vmatprep.mubr.msk.bf16.mxu1 %vm1437_vm2, %v1436_v49 }
  0xdf   : > { %v1423_v46 = vpop.eup %1422  ;;  %1378 = vmatprep.subr.bf16.mxu0 %v1436_v49  ;;  %1384 = vmatprep.subr.bf16.mxu1 %v1436_v49 }
  0xe0   : > { %v397_v47 = vadd.f32 1e-05, %v389_v45  ;;  %v443_v48 = vmul.f32 %v1423_v46, %v435_v44  ;;  %v419_v55 = vmul.f32 %v1423_v46, %v411_v42 }
  0xe2   : > { %1426 = vrsqrt.f32 %v397_v47  ;;  %v451_v39 = vpack.c.bf16 %v443_v48, %v443_v48  ;;  %v427_v56 = vpack.c.bf16 %v419_v55, %v419_v55 }
  0xe4   : > { %1369 = vmatmul.mubr.msk.bf16.vlgmr.msra.gmra.mxu0 %vm221_vm0, %v451_v39  ;;  %1375 = vmatmul.mubr.msk.bf16.vlgmr.msra.gmra.mxu1 %vm221_vm0, %v427_v56 }
  0xe5   : > { %1379 = vmatpush3.bf16.msra.mxu0 %v1582_v50  ;;  %1385 = vmatpush3.bf16.msra.mxu1 %v1584_v51 }
  0xe6   : > { %1380 = vmatprep.mubr.msk.bf16.mxu0 %vm1437_vm2, %v1436_v49  ;;  %1386 = vmatprep.mubr.msk.bf16.mxu1 %vm1437_vm2, %v1436_v49 }
  0xe7   : > { %v1425_v57 = vpop.eup %1424  ;;  %1390 = vmatprep.subr.bf16.mxu0 %v1436_v49  ;;  %1396 = vmatprep.subr.bf16.mxu1 %v1436_v49 }
  0xe8   : > { %v444_v58 = vmul.f32 %v1425_v57, %v436_v53  ;;  %v420_v52 = vmul.f32 %v1425_v57, %v412_v41 }
  0xea   : > { %v452_v15 = vpack.c.bf16 %v444_v58, %v444_v58  ;;  %v428_v59 = vpack.c.bf16 %v420_v52, %v420_v52 }
  0xec   : > { %1381 = vmatmul.mubr.msk.bf16.vlgmr.msra.gmra.mxu0 %vm221_vm0, %v452_v15  ;;  %1387 = vmatmul.mubr.msk.bf16.vlgmr.msra.gmra.mxu1 %vm221_vm0, %v428_v59 }
  0xed   : > { %1391 = vmatpush3.bf16.msra.mxu0 %v1582_v50  ;;  %1397 = vmatpush3.bf16.msra.mxu1 %v1584_v51  ;;  %v1753_v51 = vld [vmem:[%s1790_s3] ss:$0 sm:$0xff] }
  0xee   : > { %1392 = vmatprep.mubr.msk.bf16.mxu0 %vm1437_vm2, %v1436_v49  ;;  %1398 = vmatprep.mubr.msk.bf16.mxu1 %vm1437_vm2, %v1436_v49 }
  0xef   : > { %v1427_v43 = vpop.eup %1426 }
  0xf0   : > { %v445_v61 = vmul.f32 %v1427_v43, %v437_v17  ;;  %v421_v63 = vmul.f32 %v1427_v43, %v413_v54 }
  0xf2   : > { %v453_v2 = vpack.c.bf16 %v445_v61, %v445_v61  ;;  %v429_v3 = vpack.c.bf16 %v421_v63, %v421_v63 }
  0xf4   : > { %1393 = vmatmul.mubr.msk.bf16.vlgmr.msra.gmra.mxu0 %vm221_vm0, %v453_v2  ;;  %1399 = vmatmul.mubr.msk.bf16.vlgmr.msra.gmra.mxu1 %vm221_vm0, %v429_v3 }
 0x17c   : > { %v498_v50 = vpop.f32.mrf.mxu0  ;;  %v544_v60 = vpop.f32.mrf.mxu1 }
 0x17d   : > { %v545_v62 = vadd.f32 %v544_v60, %v498_v50 }
 0x17e   : > { %v1310_v49 = vpop.f32.mrf.mxu0  ;;  %v1316_v5 = vpop.f32.mrf.mxu1 }
 0x17f   : > { %v556_v6 = vadd.f32 %v1753_v51, %v545_v62 }
 0x180   : > { %v501_v8 = vpop.f32.mrf.mxu0  ;;  %v547_v10 = vpop.f32.mrf.mxu1 }
 0x181   : > { %557 = vst.msk [vmem:[%s1758_s5] sm:$0xff] %vm221_vm0, %v556_v6 }
 0x182   : > { %v1311_v11 = vpop.f32.mrf.mxu0  ;;  %v1317_v12 = vpop.f32.mrf.mxu1 }
 0x184   : > { %v595_v13 = vpop.f32.mrf.mxu0  ;;  %v638_v16 = vpop.f32.mrf.mxu1 }
 0x185   : > { %v639_v18 = vadd.f32 %v638_v16, %v595_v13 }
 0x186   : > { %v1322_v19 = vpop.f32.mrf.mxu0  ;;  %v1328_v20 = vpop.f32.mrf.mxu1 }
 0x187   : > { %v644_v23 = vadd.f32 %v1753_v51, %v639_v18 }
 0x188   : > { %v598_v21 = vpop.f32.mrf.mxu0  ;;  %v641_v25 = vpop.f32.mrf.mxu1 }
 0x189   : > { %1252 = vst.msk [vmem:[%s1758_s5 + $0x8] sm:$0xff] %vm221_vm0, %v644_v23 }
 0x18a   : > { %v1323_v4 = vpop.f32.mrf.mxu0  ;;  %v1329_v0 = vpop.f32.mrf.mxu1 }
 0x18c   : > { %v684_v1 = vpop.f32.mrf.mxu0  ;;  %v727_v22 = vpop.f32.mrf.mxu1 }
 0x18d   : > { %v728_v24 = vadd.f32 %v727_v22, %v684_v1 }
 0x18e   : > { %v1334_v26 = vpop.f32.mrf.mxu0  ;;  %v1340_v27 = vpop.f32.mrf.mxu1 }
 0x18f   : > { %v733_v29 = vadd.f32 %v1753_v51, %v728_v24 }
 0x190   : > { %v687_v30 = vpop.f32.mrf.mxu0  ;;  %v730_v32 = vpop.f32.mrf.mxu1 }
 0x191   : > { %1255 = vst.msk [vmem:[%s1758_s5 + $0x10] sm:$0xff] %vm221_vm0, %v733_v29 }
 0x192   : > { %v1335_v34 = vpop.f32.mrf.mxu0  ;;  %v1341_v7 = vpop.f32.mrf.mxu1 }
 0x194   : > { %v773_v35 = vpop.f32.mrf.mxu0  ;;  %v816_v9 = vpop.f32.mrf.mxu1 }
 0x195   : > { %v817_v28 = vadd.f32 %v816_v9, %v773_v35 }
 0x196   : > { %v1346_v36 = vpop.f32.mrf.mxu0  ;;  %v1352_v37 = vpop.f32.mrf.mxu1 }
 0x197   : > { %v822_v31 = vadd.f32 %v1753_v51, %v817_v28 }
 0x198   : > { %v776_v38 = vpop.f32.mrf.mxu0  ;;  %v819_v33 = vpop.f32.mrf.mxu1 }
 0x199   : > { %1258 = vst.msk [vmem:[%s1758_s5 + $0x18] sm:$0xff] %vm221_vm0, %v822_v31 }
 0x19a   : > { %v1347_v14 = vpop.f32.mrf.mxu0  ;;  %v1353_v40 = vpop.f32.mrf.mxu1 }
 0x19c   : > { %v862_v42 = vpop.f32.mrf.mxu0  ;;  %v905_v44 = vpop.f32.mrf.mxu1 }
 0x19d   : > { %v906_v45 = vadd.f32 %v905_v44, %v862_v42 }
 0x19e   : > { %v1358_v46 = vpop.f32.mrf.mxu0  ;;  %v1364_v47 = vpop.f32.mrf.mxu1 }
 0x19f   : > { %v911_v48 = vadd.f32 %v1753_v51, %v906_v45 }
 0x1a0   : > { %v865_v55 = vpop.f32.mrf.mxu0  ;;  %v908_v39 = vpop.f32.mrf.mxu1 }
 0x1a1   : > { %1261 = vst.msk [vmem:[%s1758_s5 + $0x20] sm:$0xff] %vm221_vm0, %v911_v48 }
 0x1a2   : > { %v1359_v56 = vpop.f32.mrf.mxu0  ;;  %v1365_v41 = vpop.f32.mrf.mxu1 }
 0x1a4   : > { %v951_v53 = vpop.f32.mrf.mxu0  ;;  %v994_v57 = vpop.f32.mrf.mxu1 }
 0x1a5   : > { %v995_v58 = vadd.f32 %v994_v57, %v951_v53 }
 0x1a6   : > { %v1370_v52 = vpop.f32.mrf.mxu0  ;;  %v1376_v15 = vpop.f32.mrf.mxu1 }
 0x1a7   : > { %v1000_v59 = vadd.f32 %v1753_v51, %v995_v58 }
 0x1a8   : > { %v954_v54 = vpop.f32.mrf.mxu0  ;;  %v997_v17 = vpop.f32.mrf.mxu1 }
 0x1a9   : > { %1264 = vst.msk [vmem:[%s1758_s5 + $0x28] sm:$0xff] %vm221_vm0, %v1000_v59 }
 0x1aa   : > { %v1371_v43 = vpop.f32.mrf.mxu0  ;;  %v1377_v61 = vpop.f32.mrf.mxu1 }
 0x1ac   : > { %v1040_v63 = vpop.f32.mrf.mxu0  ;;  %v1083_v2 = vpop.f32.mrf.mxu1 }
 0x1ad   : > { %v1084_v3 = vadd.f32 %v1083_v2, %v1040_v63 }
 0x1ae   : > { %v1382_v50 = vpop.f32.mrf.mxu0  ;;  %v1388_v60 = vpop.f32.mrf.mxu1 }
 0x1af   : > { %v1089_v62 = vadd.f32 %v1753_v51, %v1084_v3 }
 0x1b0   : > { %v1043_v49 = vpop.f32.mrf.mxu0  ;;  %v1086_v5 = vpop.f32.mrf.mxu1 }
 0x1b1   : > { %1267 = vst.msk [vmem:[%s1758_s5 + $0x30] sm:$0xff] %vm221_vm0, %v1089_v62 }
 0x1b2   : > { %v1383_v6 = vpop.f32.mrf.mxu0  ;;  %v1389_v8 = vpop.f32.mrf.mxu1 }
 0x1b4   : > { %v1129_v10 = vpop.f32.mrf.mxu0  ;;  %v1172_v11 = vpop.f32.mrf.mxu1 }
 0x1b5   : > { %v1173_v12 = vadd.f32 %v1172_v11, %v1129_v10 }
 0x1b6   : > { %v1394_v13 = vpop.f32.mrf.mxu0  ;;  %v1400_v16 = vpop.f32.mrf.mxu1 }
 0x1b7   : > { %v1178_v18 = vadd.f32 %v1753_v51, %v1173_v12 }
 0x1b8   : > { %v1132_v19 = vpop.f32.mrf.mxu0  ;;  %v1175_v20 = vpop.f32.mrf.mxu1 }
 0x1b9   : > { %1270 = vst.msk [vmem:[%s1758_s5 + $0x38] sm:$0xff] %vm221_vm0, %v1178_v18 }
 0x1ba   : > { %v1395_v23 = vpop.f32.mrf.mxu0  ;;  %v1401_v21 = vpop.f32.mrf.mxu1 }
 0x1bb PF: > { %s14_s15 = sadd.s32 1, %s1434_s15  }
 0x1bc   : > { %p11_p4 = scmp.ge.s32.totalorder %s14_s15, 4  }
 0x1be   :  { %13 = sbr.rel (!%p11_p4) target bundleno = 1 (0x1), region = 73 }

</bundles_post_ra>
